<compile_context>
chip_gen: v7x
topology: tpu7x:2x2x1
jax: 0.10.0
libtpu: 0.0.40
codegen_flags: <defaults>
</compile_context>

<pallas_src>
import functools

import jax
import jax.numpy as jnp
from jax import lax
from jax.experimental import pallas as pl
from jax.experimental.pallas import tpu as pltpu


def mha_kernel(x_ref, wqkv_ref, bqkv_ref, wo_ref, bo_ref, o_ref,
               qkv_ref, concat_ref, *,
               num_heads, head_dim, tq, tk, tp, heads_per_group):
    E = num_heads * head_dim
    S = x_ref.shape[1]
    qi = pl.program_id(1)

    # ---------------------------------------------------------------------
    # Phase 1 (once per batch row, at the first q tile): fused QKV projection
    # x(S,E) @ W_qkv(E,3E) + b, computed in row chunks of tp to bound the
    # register live-set, staged into bf16 VMEM scratch.
    # ---------------------------------------------------------------------
    @pl.when(qi == 0)
    def _():
        # Hoist the bias broadcast out of the chunk loop (no CSE of
        # broadcast_in_dim inside loops).
        bias = jnp.broadcast_to(bqkv_ref[...], (tp, 3 * E))  # f32

        def proj_body(i, carry):
            r = pl.multiple_of(i * tp, tp)
            xc = x_ref[0, pl.ds(r, tp), :]                        # (tp, E) bf16
            chunk = jnp.dot(xc, wqkv_ref[...],
                            preferred_element_type=jnp.float32) + bias
            qkv_ref[pl.ds(r, tp), :] = chunk.astype(qkv_ref.dtype)
            return carry

        lax.fori_loop(0, S // tp, proj_body, 0, unroll=True)

    # ---------------------------------------------------------------------
    # Phase 2: flash-style online-softmax attention for this query tile.
    # Heads are processed in lane-dense groups; each head runs a KV-tiled
    # online-softmax loop (no (S,S) score matrix is ever live).
    # ---------------------------------------------------------------------
    q_off = pl.multiple_of(qi * tq, tq)
    n_kv = S // tk
    num_groups = num_heads // heads_per_group

    for g in range(num_groups):
        group_outs = []
        for hh in range(heads_per_group):
            h = g * heads_per_group + hh
            lo = h * head_dim                                     # static offset
            q_h = qkv_ref[pl.ds(q_off, tq), lo:lo + head_dim]     # (tq, d) bf16

            def kv_body(j, carry, lo=lo, q_h=q_h):
                m_i, l_i, acc = carry
                k_off = pl.multiple_of(j * tk, tk)
                k_j = qkv_ref[pl.ds(k_off, tk),
                              E + lo:E + lo + head_dim]           # (tk, d) bf16
                v_j = qkv_ref[pl.ds(k_off, tk),
                              2 * E + lo:2 * E + lo + head_dim]   # (tk, d) bf16
                # Scores Q K^T without an explicit transpose (contract dim 1
                # of both).  NOTE: no 1/sqrt(d) scaling, matching the torch
                # module exactly.
                s = lax.dot_general(q_h, k_j, (((1,), (1,)), ((), ())),
                                    preferred_element_type=jnp.float32)
                m_new = jnp.maximum(m_i, jnp.max(s, axis=-1, keepdims=True))
                alpha = jnp.exp(m_i - m_new)
                p = jnp.exp(s - m_new)                            # f32
                l_new = alpha * l_i + jnp.sum(p, axis=-1, keepdims=True)
                acc_new = alpha * acc + jnp.dot(
                    p.astype(v_j.dtype), v_j,
                    preferred_element_type=jnp.float32)
                return m_new, l_new, acc_new

            carry0 = (jnp.full((tq, 1), -jnp.inf, dtype=jnp.float32),
                      jnp.zeros((tq, 1), dtype=jnp.float32),
                      jnp.zeros((tq, head_dim), dtype=jnp.float32))
            _, l_f, acc_f = lax.fori_loop(0, n_kv, kv_body, carry0,
                                          unroll=(n_kv <= 4))
            h_out = acc_f * pl.reciprocal(l_f, approx=True)       # f32
            group_outs.append(h_out.astype(concat_ref.dtype))

        # One lane-dense store per head group (e.g. 2 x d=64 heads -> 128
        # lanes at production sizes; full E width at the toy size).
        glo = g * heads_per_group * head_dim
        gw = heads_per_group * head_dim
        concat_ref[:, glo:glo + gw] = (
            group_outs[0] if heads_per_group == 1
            else jnp.concatenate(group_outs, axis=-1))

    # ---------------------------------------------------------------------
    # Phase 3: single fused output projection over all heads.
    # ---------------------------------------------------------------------
    out = (jnp.dot(concat_ref[...], wo_ref[...],
                   preferred_element_type=jnp.float32)
           + bo_ref[...])                                          # (tq, E) f32
    o_ref[0] = out.astype(o_ref.dtype)


def multi_head_attention(x, w_qkv, b_qkv, w_out_t, b_out, *, num_heads,
                         q_tile=256, kv_tile=256, proj_tile=256,
                         vmem_limit_bytes=48 * 1024 * 1024):
    """x: (B, S, E); w_qkv: (E, 3E) = [Wq^T | Wk^T | Wv^T] with heads
    concatenated inside each block; b_qkv: (1, 3E); w_out_t: (E, E) =
    output_linear.weight^T; b_out: (1, E).

    Default tiles target v6e/v7x (256-multiples); pass q_tile=kv_tile=128 for
    v5e's 4x128x128 MXU."""
    B, S, E = x.shape
    head_dim = E // num_heads
    assert num_heads * head_dim == E

    tq = min(S, q_tile)
    tk = min(S, kv_tile)
    tp = min(S, proj_tile)
    # TODO(synk): ragged sequence lengths (S not a multiple of the tiles) need
    # tail masking; not required for the demo / padded encoder inputs.
    assert S % tq == 0 and S % tk == 0 and S % tp == 0, "S must be tileable"

    # Heads per group: aim for >=128-lane concat stores (e.g. 2 heads at
    # d=64), capped at num_heads; must divide num_heads.
    hg = max(1, min(num_heads, 128 // max(1, head_dim)))
    while num_heads % hg:
        hg -= 1

    # bf16 MXU operands (f32 accumulation inside the kernel); biases stay f32.
    x_bf = x.astype(jnp.bfloat16)
    w_qkv_bf = w_qkv.astype(jnp.bfloat16)
    w_out_bf = w_out_t.astype(jnp.bfloat16)
    b_qkv_f = b_qkv.astype(jnp.float32)
    b_out_f = b_out.astype(jnp.float32)

    kernel = functools.partial(
        mha_kernel, num_heads=num_heads, head_dim=head_dim,
        tq=tq, tk=tk, tp=tp, heads_per_group=hg)

    return pl.pallas_call(
        kernel,
        out_shape=jax.ShapeDtypeStruct((B, S, E), x.dtype),
        grid_spec=pltpu.PrefetchScalarGridSpec(
            num_scalar_prefetch=0,
            grid=(B, S // tq),
            in_specs=[
                # x: whole batch row, resident across q tiles (index constant
                # in qi so it is only re-DMA'd when the batch index changes).
                pl.BlockSpec((1, S, E), lambda b, q: (b, 0, 0)),
                # Weights / biases: constant index_map -> DMA'd once, resident.
                # TODO(synk): pipeline_mode=pl.Buffered(1) on these would halve
                # their VMEM footprint (useful headroom on v7x's 64 MiB).
                pl.BlockSpec((E, 3 * E), lambda b, q: (0, 0)),   # fused QKV W
                pl.BlockSpec((1, 3 * E), lambda b, q: (0, 0)),   # fused QKV b
                pl.BlockSpec((E, E), lambda b, q: (0, 0)),       # output W^T
                pl.BlockSpec((1, E), lambda b, q: (0, 0)),       # output bias
            ],
            out_specs=pl.BlockSpec((1, tq, E), lambda b, q: (b, q, 0)),
            scratch_shapes=[
                pltpu.VMEM((S, 3 * E), jnp.bfloat16),  # fused QKV, per batch row
                pltpu.VMEM((tq, E), jnp.bfloat16),     # per-q-tile head concat
            ],
        ),
        compiler_params=pltpu.CompilerParams(
            dimension_semantics=("parallel", "arbitrary"),
            vmem_limit_bytes=vmem_limit_bytes),
    )(x_bf, w_qkv_bf, b_qkv_f, w_out_bf, b_out_f)


def reference_mha(x, wq, bq, wk, bk, wv, bv, wo_t, bo):
    """Pure-JAX f32 reference of the PyTorch forward (per-head formulation)."""
    H = wq.shape[0]
    heads = []
    for h in range(H):
        q = x @ wq[h] + bq[h]
        k = x @ wk[h] + bk[h]
        v = x @ wv[h] + bv[h]
        a = jax.nn.softmax(jnp.einsum('bid,bjd->bij', q, k), axis=-1)
        heads.append(jnp.einsum('bij,bjd->bid', a, v))
    concat = jnp.concatenate(heads, axis=-1)
    return concat @ wo_t + bo


if __name__ == "__main__":
    B, S, E, NH = 2, 8, 32, 4
    d = E // NH

    key = jax.random.PRNGKey(0)
    keys = jax.random.split(key, 9)
    scale = 0.1

    x = jax.random.normal(keys[0], (B, S, E), dtype=jnp.float32)

    # Per-head params stored in "x @ W^T" form: wq[h]: (E, d), bq[h]: (d,).
    wq = scale * jax.random.normal(keys[1], (NH, E, d), dtype=jnp.float32)
    wk = scale * jax.random.normal(keys[2], (NH, E, d), dtype=jnp.float32)
    wv = scale * jax.random.normal(keys[3], (NH, E, d), dtype=jnp.float32)
    bq = scale * jax.random.normal(keys[4], (NH, d), dtype=jnp.float32)
    bk = scale * jax.random.normal(keys[5], (NH, d), dtype=jnp.float32)
    bv = scale * jax.random.normal(keys[6], (NH, d), dtype=jnp.float32)

    # output_linear: y = concat @ W^T + b; store W^T directly.
    wo_t = scale * jax.random.normal(keys[7], (E, E), dtype=jnp.float32)
    bo = scale * jax.random.normal(keys[8], (E,), dtype=jnp.float32)

    # --- pack fused parameters for the kernel (plain JAX, outside the kernel) ---
    def stack_heads(w):  # (H, E, d) -> (E, H*d), heads concatenated along lanes
        return jnp.transpose(w, (1, 0, 2)).reshape(E, NH * d)

    w_qkv = jnp.concatenate(
        [stack_heads(wq), stack_heads(wk), stack_heads(wv)], axis=1)  # (E, 3E)
    b_qkv = jnp.concatenate(
        [bq.reshape(-1), bk.reshape(-1), bv.reshape(-1)])[None, :]    # (1, 3E)
    b_out = bo[None, :]                                               # (1, E)

    out = multi_head_attention(x, w_qkv, b_qkv, wo_t, b_out, num_heads=NH)
    out = jax.block_until_ready(out)

    ref = reference_mha(x, wq, bq, wk, bk, wv, bv, wo_t, bo)

    assert out.shape == (B, S, E)
    # Tolerance accounts for bf16 MXU operands (f32 accumulation), online
    # softmax re-association, and pl.reciprocal(approx=True) vs. the pure-f32
    # reference.  Structural bugs (wrong head packing / missing bias) would
    # produce errors far above this.
    assert jnp.allclose(out, ref, atol=5e-2, rtol=5e-2), "mismatch vs reference"

    print("KERNEL_OK")
</pallas_src>

<mosaic_0001>
module attributes {stable_mosaic.version = 11 : i64} {
  func.func @mha_kernel(%arg0: i32, %arg1: i32, %arg2: memref<1x8x32xbf16, #tpu.memory_space<vmem>>, %arg3: memref<32x96xbf16, #tpu.memory_space<vmem>>, %arg4: memref<1x96xf32, #tpu.memory_space<vmem>>, %arg5: memref<32x32xbf16, #tpu.memory_space<vmem>>, %arg6: memref<1x32xf32, #tpu.memory_space<vmem>>, %arg7: memref<1x8x32xf32, #tpu.memory_space<vmem>>, %arg8: memref<8x96xbf16, #tpu.memory_space<vmem>>, %arg9: memref<8x32xbf16, #tpu.memory_space<vmem>>) attributes {dimension_semantics = [#tpu.dimension_semantics<parallel>, #tpu.dimension_semantics<arbitrary>], iteration_bounds = array<i64: 2, 1>, scalar_prefetch = 0 : i64, scratch_operands = 2 : i64, tpu.core_type = #tpu.core_type<tc>, window_params = [{transform_indices = @transform_0, window_bounds = array<i64: 1, 8, 32>}, {pipeline_mode = #tpu.pipeline_mode<synchronous>, transform_indices = @transform_1, window_bounds = array<i64: 32, 96>}, {pipeline_mode = #tpu.pipeline_mode<synchronous>, transform_indices = @transform_2, window_bounds = array<i64: 1, 96>}, {pipeline_mode = #tpu.pipeline_mode<synchronous>, transform_indices = @transform_3, window_bounds = array<i64: 32, 32>}, {pipeline_mode = #tpu.pipeline_mode<synchronous>, transform_indices = @transform_4, window_bounds = array<i64: 1, 32>}, {transform_indices = @transform_5, window_bounds = array<i64: 1, 8, 32>}]} {
    %c0_i32 = arith.constant 0 : i32
    %0 = arith.cmpi eq, %arg1, %c0_i32 : i32
    %1 = arith.extui %0 : i1 to i32
    %c0_i32_0 = arith.constant 0 : i32
    %2 = arith.cmpi ne, %1, %c0_i32_0 : i32
    scf.if %2 {
      %c0_51 = arith.constant 0 : index
      %c0_52 = arith.constant 0 : index
      %148 = vector.load %arg4[%c0_51, %c0_52] : memref<1x96xf32, #tpu.memory_space<vmem>>, vector<1x96xf32>
      %149 = vector.shape_cast %148 : vector<1x96xf32> to vector<1x96xf32>
      %150 = vector.broadcast %149 : vector<1x96xf32> to vector<8x96xf32>
      %c0_i32_53 = arith.constant 0 : i32
      %c8_i32_54 = arith.constant 8 : i32
      %151 = arith.muli %c0_i32_53, %c8_i32_54 : i32
      %152 = tpu.assume_multiple %151, 8 : i32
      %c0_55 = arith.constant 0 : index
      %153 = arith.index_cast %152 : i32 to index
      %c0_56 = arith.constant 0 : index
      %154 = vector.load %arg2[%c0_55, %153, %c0_56] : memref<1x8x32xbf16, #tpu.memory_space<vmem>>, vector<1x8x32xbf16>
      %155 = vector.shape_cast %154 : vector<1x8x32xbf16> to vector<8x32xbf16>
      %c0_57 = arith.constant 0 : index
      %c0_58 = arith.constant 0 : index
      %156 = vector.load %arg3[%c0_57, %c0_58] : memref<32x96xbf16, #tpu.memory_space<vmem>>, vector<32x96xbf16>
      %cst_59 = arith.constant dense<0.000000e+00> : vector<8x96xf32>
      %157 = tpu.matmul %155, %156, %cst_59 {dimension_numbers = #tpu.dot_dimension_numbers<[1], [0], [0], [1], [0, 0, 1, 1], [], []>} : vector<8x32xbf16>, vector<32x96xbf16>, vector<8x96xf32> -> vector<8x96xf32>
      %158 = arith.addf %157, %150 : vector<8x96xf32>
      %159 = arith.truncf %158 : vector<8x96xf32> to vector<8x96xbf16>
      %160 = arith.index_cast %152 : i32 to index
      %c0_60 = arith.constant 0 : index
      %161 = vector.load %arg8[%160, %c0_60] : memref<8x96xbf16, #tpu.memory_space<vmem>>, vector<8x96xbf16>
      tpu.vector_store %arg8[%160, %c0_60], %159 {strides = array<i32>} : memref<8x96xbf16, #tpu.memory_space<vmem>>, vector<8x96xbf16>,
      %c1_i32_61 = arith.constant 1 : i32
    } else {
    }
    %c8_i32 = arith.constant 8 : i32
    %3 = arith.muli %arg1, %c8_i32 : i32
    %4 = tpu.assume_multiple %3, 8 : i32
    %5 = arith.index_cast %4 : i32 to index
    %c0 = arith.constant 0 : index
    %6 = vector.load %arg8[%5, %c0] : memref<8x96xbf16, #tpu.memory_space<vmem>>, vector<8x8xbf16>
    %cst = arith.constant 0xFF800000 : f32
    %7 = vector.broadcast %cst : f32 to vector<8x1xf32>
    %cst_1 = arith.constant 0.000000e+00 : f32
    %8 = vector.broadcast %cst_1 : f32 to vector<8x1xf32>
    %cst_2 = arith.constant 0.000000e+00 : f32
    %9 = vector.broadcast %cst_2 : f32 to vector<8x8xf32>
    %c0_i32_3 = arith.constant 0 : i32
    %c8_i32_4 = arith.constant 8 : i32
    %10 = arith.muli %c0_i32_3, %c8_i32_4 : i32
    %11 = tpu.assume_multiple %10, 8 : i32
    %12 = arith.index_cast %11 : i32 to index
    %c32 = arith.constant 32 : index
    %13 = vector.load %arg8[%12, %c32] : memref<8x96xbf16, #tpu.memory_space<vmem>>, vector<8x8xbf16>
    %14 = arith.index_cast %11 : i32 to index
    %c64 = arith.constant 64 : index
    %15 = vector.load %arg8[%14, %c64] : memref<8x96xbf16, #tpu.memory_space<vmem>>, vector<8x8xbf16>
    %cst_5 = arith.constant dense<0.000000e+00> : vector<8x8xf32>
    %16 = tpu.matmul %6, %13, %cst_5 {dimension_numbers = #tpu.dot_dimension_numbers<[1], [1], [0], [0], [0, 0, 1, 0], [], []>} : vector<8x8xbf16>, vector<8x8xbf16>, vector<8x8xf32> -> vector<8x8xf32>
    %cst_6 = arith.constant dense<0xFF800000> : vector<8xf32>
    %17 = vector.multi_reduction <maximumf>, %16, %cst_6 [1] : vector<8x8xf32> to vector<8xf32>
    %18 = vector.shape_cast %17 : vector<8xf32> to vector<8x1xf32>
    %19 = arith.maximumf %7, %18 : vector<8x1xf32>
    %20 = arith.subf %7, %19 : vector<8x1xf32>
    %21 = math.exp %20 : vector<8x1xf32>
    %22 = vector.broadcast %19 : vector<8x1xf32> to vector<8x8xf32>
    %23 = arith.subf %16, %22 : vector<8x8xf32>
    %24 = math.exp %23 : vector<8x8xf32>
    %25 = arith.mulf %21, %8 : vector<8x1xf32>
    %cst_7 = arith.constant dense<0.000000e+00> : vector<8xf32>
    %26 = vector.multi_reduction <add>, %24, %cst_7 [1] : vector<8x8xf32> to vector<8xf32>
    %27 = vector.shape_cast %26 : vector<8xf32> to vector<8x1xf32>
    %28 = arith.addf %25, %27 : vector<8x1xf32>
    %29 = vector.broadcast %21 : vector<8x1xf32> to vector<8x8xf32>
    %30 = arith.mulf %29, %9 : vector<8x8xf32>
    %31 = arith.truncf %24 : vector<8x8xf32> to vector<8x8xbf16>
    %cst_8 = arith.constant dense<0.000000e+00> : vector<8x8xf32>
    %32 = tpu.matmul %31, %15, %cst_8 {dimension_numbers = #tpu.dot_dimension_numbers<[1], [0], [0], [1], [0, 0, 1, 1], [], []>} : vector<8x8xbf16>, vector<8x8xbf16>, vector<8x8xf32> -> vector<8x8xf32>
    %33 = arith.addf %30, %32 : vector<8x8xf32>
    %c1_i32 = arith.constant 1 : i32
    %34 = tpu.reciprocal %28 {approx = true} : vector<8x1xf32> -> vector<8x1xf32>
    %35 = vector.broadcast %34 : vector<8x1xf32> to vector<8x8xf32>
    %36 = arith.mulf %33, %35 : vector<8x8xf32>
    %37 = arith.truncf %36 : vector<8x8xf32> to vector<8x8xbf16>
    %38 = arith.index_cast %4 : i32 to index
    %c8 = arith.constant 8 : index
    %39 = vector.load %arg8[%38, %c8] : memref<8x96xbf16, #tpu.memory_space<vmem>>, vector<8x8xbf16>
    %cst_9 = arith.constant 0xFF800000 : f32
    %40 = vector.broadcast %cst_9 : f32 to vector<8x1xf32>
    %cst_10 = arith.constant 0.000000e+00 : f32
    %41 = vector.broadcast %cst_10 : f32 to vector<8x1xf32>
    %cst_11 = arith.constant 0.000000e+00 : f32
    %42 = vector.broadcast %cst_11 : f32 to vector<8x8xf32>
    %c0_i32_12 = arith.constant 0 : i32
    %c8_i32_13 = arith.constant 8 : i32
    %43 = arith.muli %c0_i32_12, %c8_i32_13 : i32
    %44 = tpu.assume_multiple %43, 8 : i32
    %45 = arith.index_cast %44 : i32 to index
    %c40 = arith.constant 40 : index
    %46 = vector.load %arg8[%45, %c40] : memref<8x96xbf16, #tpu.memory_space<vmem>>, vector<8x8xbf16>
    %47 = arith.index_cast %44 : i32 to index
    %c72 = arith.constant 72 : index
    %48 = vector.load %arg8[%47, %c72] : memref<8x96xbf16, #tpu.memory_space<vmem>>, vector<8x8xbf16>
    %cst_14 = arith.constant dense<0.000000e+00> : vector<8x8xf32>
    %49 = tpu.matmul %39, %46, %cst_14 {dimension_numbers = #tpu.dot_dimension_numbers<[1], [1], [0], [0], [0, 0, 1, 0], [], []>} : vector<8x8xbf16>, vector<8x8xbf16>, vector<8x8xf32> -> vector<8x8xf32>
    %cst_15 = arith.constant dense<0xFF800000> : vector<8xf32>
    %50 = vector.multi_reduction <maximumf>, %49, %cst_15 [1] : vector<8x8xf32> to vector<8xf32>
    %51 = vector.shape_cast %50 : vector<8xf32> to vector<8x1xf32>
    %52 = arith.maximumf %40, %51 : vector<8x1xf32>
    %53 = arith.subf %40, %52 : vector<8x1xf32>
    %54 = math.exp %53 : vector<8x1xf32>
    %55 = vector.broadcast %52 : vector<8x1xf32> to vector<8x8xf32>
    %56 = arith.subf %49, %55 : vector<8x8xf32>
    %57 = math.exp %56 : vector<8x8xf32>
    %58 = arith.mulf %54, %41 : vector<8x1xf32>
    %cst_16 = arith.constant dense<0.000000e+00> : vector<8xf32>
    %59 = vector.multi_reduction <add>, %57, %cst_16 [1] : vector<8x8xf32> to vector<8xf32>
    %60 = vector.shape_cast %59 : vector<8xf32> to vector<8x1xf32>
    %61 = arith.addf %58, %60 : vector<8x1xf32>
    %62 = vector.broadcast %54 : vector<8x1xf32> to vector<8x8xf32>
    %63 = arith.mulf %62, %42 : vector<8x8xf32>
    %64 = arith.truncf %57 : vector<8x8xf32> to vector<8x8xbf16>
    %cst_17 = arith.constant dense<0.000000e+00> : vector<8x8xf32>
    %65 = tpu.matmul %64, %48, %cst_17 {dimension_numbers = #tpu.dot_dimension_numbers<[1], [0], [0], [1], [0, 0, 1, 1], [], []>} : vector<8x8xbf16>, vector<8x8xbf16>, vector<8x8xf32> -> vector<8x8xf32>
    %66 = arith.addf %63, %65 : vector<8x8xf32>
    %c1_i32_18 = arith.constant 1 : i32
    %67 = tpu.reciprocal %61 {approx = true} : vector<8x1xf32> -> vector<8x1xf32>
    %68 = vector.broadcast %67 : vector<8x1xf32> to vector<8x8xf32>
    %69 = arith.mulf %66, %68 : vector<8x8xf32>
    %70 = arith.truncf %69 : vector<8x8xf32> to vector<8x8xbf16>
    %71 = arith.index_cast %4 : i32 to index
    %c16 = arith.constant 16 : index
    %72 = vector.load %arg8[%71, %c16] : memref<8x96xbf16, #tpu.memory_space<vmem>>, vector<8x8xbf16>
    %cst_19 = arith.constant 0xFF800000 : f32
    %73 = vector.broadcast %cst_19 : f32 to vector<8x1xf32>
    %cst_20 = arith.constant 0.000000e+00 : f32
    %74 = vector.broadcast %cst_20 : f32 to vector<8x1xf32>
    %cst_21 = arith.constant 0.000000e+00 : f32
    %75 = vector.broadcast %cst_21 : f32 to vector<8x8xf32>
    %c0_i32_22 = arith.constant 0 : i32
    %c8_i32_23 = arith.constant 8 : i32
    %76 = arith.muli %c0_i32_22, %c8_i32_23 : i32
    %77 = tpu.assume_multiple %76, 8 : i32
    %78 = arith.index_cast %77 : i32 to index
    %c48 = arith.constant 48 : index
    %79 = vector.load %arg8[%78, %c48] : memref<8x96xbf16, #tpu.memory_space<vmem>>, vector<8x8xbf16>
    %80 = arith.index_cast %77 : i32 to index
    %c80 = arith.constant 80 : index
    %81 = vector.load %arg8[%80, %c80] : memref<8x96xbf16, #tpu.memory_space<vmem>>, vector<8x8xbf16>
    %cst_24 = arith.constant dense<0.000000e+00> : vector<8x8xf32>
    %82 = tpu.matmul %72, %79, %cst_24 {dimension_numbers = #tpu.dot_dimension_numbers<[1], [1], [0], [0], [0, 0, 1, 0], [], []>} : vector<8x8xbf16>, vector<8x8xbf16>, vector<8x8xf32> -> vector<8x8xf32>
    %cst_25 = arith.constant dense<0xFF800000> : vector<8xf32>
    %83 = vector.multi_reduction <maximumf>, %82, %cst_25 [1] : vector<8x8xf32> to vector<8xf32>
    %84 = vector.shape_cast %83 : vector<8xf32> to vector<8x1xf32>
    %85 = arith.maximumf %73, %84 : vector<8x1xf32>
    %86 = arith.subf %73, %85 : vector<8x1xf32>
    %87 = math.exp %86 : vector<8x1xf32>
    %88 = vector.broadcast %85 : vector<8x1xf32> to vector<8x8xf32>
    %89 = arith.subf %82, %88 : vector<8x8xf32>
    %90 = math.exp %89 : vector<8x8xf32>
    %91 = arith.mulf %87, %74 : vector<8x1xf32>
    %cst_26 = arith.constant dense<0.000000e+00> : vector<8xf32>
    %92 = vector.multi_reduction <add>, %90, %cst_26 [1] : vector<8x8xf32> to vector<8xf32>
    %93 = vector.shape_cast %92 : vector<8xf32> to vector<8x1xf32>
    %94 = arith.addf %91, %93 : vector<8x1xf32>
    %95 = vector.broadcast %87 : vector<8x1xf32> to vector<8x8xf32>
    %96 = arith.mulf %95, %75 : vector<8x8xf32>
    %97 = arith.truncf %90 : vector<8x8xf32> to vector<8x8xbf16>
    %cst_27 = arith.constant dense<0.000000e+00> : vector<8x8xf32>
    %98 = tpu.matmul %97, %81, %cst_27 {dimension_numbers = #tpu.dot_dimension_numbers<[1], [0], [0], [1], [0, 0, 1, 1], [], []>} : vector<8x8xbf16>, vector<8x8xbf16>, vector<8x8xf32> -> vector<8x8xf32>
    %99 = arith.addf %96, %98 : vector<8x8xf32>
    %c1_i32_28 = arith.constant 1 : i32
    %100 = tpu.reciprocal %94 {approx = true} : vector<8x1xf32> -> vector<8x1xf32>
    %101 = vector.broadcast %100 : vector<8x1xf32> to vector<8x8xf32>
    %102 = arith.mulf %99, %101 : vector<8x8xf32>
    %103 = arith.truncf %102 : vector<8x8xf32> to vector<8x8xbf16>
    %104 = arith.index_cast %4 : i32 to index
    %c24 = arith.constant 24 : index
    %105 = vector.load %arg8[%104, %c24] : memref<8x96xbf16, #tpu.memory_space<vmem>>, vector<8x8xbf16>
    %cst_29 = arith.constant 0xFF800000 : f32
    %106 = vector.broadcast %cst_29 : f32 to vector<8x1xf32>
    %cst_30 = arith.constant 0.000000e+00 : f32
    %107 = vector.broadcast %cst_30 : f32 to vector<8x1xf32>
    %cst_31 = arith.constant 0.000000e+00 : f32
    %108 = vector.broadcast %cst_31 : f32 to vector<8x8xf32>
    %c0_i32_32 = arith.constant 0 : i32
    %c8_i32_33 = arith.constant 8 : i32
    %109 = arith.muli %c0_i32_32, %c8_i32_33 : i32
    %110 = tpu.assume_multiple %109, 8 : i32
    %111 = arith.index_cast %110 : i32 to index
    %c56 = arith.constant 56 : index
    %112 = vector.load %arg8[%111, %c56] : memref<8x96xbf16, #tpu.memory_space<vmem>>, vector<8x8xbf16>
    %113 = arith.index_cast %110 : i32 to index
    %c88 = arith.constant 88 : index
    %114 = vector.load %arg8[%113, %c88] : memref<8x96xbf16, #tpu.memory_space<vmem>>, vector<8x8xbf16>
    %cst_34 = arith.constant dense<0.000000e+00> : vector<8x8xf32>
    %115 = tpu.matmul %105, %112, %cst_34 {dimension_numbers = #tpu.dot_dimension_numbers<[1], [1], [0], [0], [0, 0, 1, 0], [], []>} : vector<8x8xbf16>, vector<8x8xbf16>, vector<8x8xf32> -> vector<8x8xf32>
    %cst_35 = arith.constant dense<0xFF800000> : vector<8xf32>
    %116 = vector.multi_reduction <maximumf>, %115, %cst_35 [1] : vector<8x8xf32> to vector<8xf32>
    %117 = vector.shape_cast %116 : vector<8xf32> to vector<8x1xf32>
    %118 = arith.maximumf %106, %117 : vector<8x1xf32>
    %119 = arith.subf %106, %118 : vector<8x1xf32>
    %120 = math.exp %119 : vector<8x1xf32>
    %121 = vector.broadcast %118 : vector<8x1xf32> to vector<8x8xf32>
    %122 = arith.subf %115, %121 : vector<8x8xf32>
    %123 = math.exp %122 : vector<8x8xf32>
    %124 = arith.mulf %120, %107 : vector<8x1xf32>
    %cst_36 = arith.constant dense<0.000000e+00> : vector<8xf32>
    %125 = vector.multi_reduction <add>, %123, %cst_36 [1] : vector<8x8xf32> to vector<8xf32>
    %126 = vector.shape_cast %125 : vector<8xf32> to vector<8x1xf32>
    %127 = arith.addf %124, %126 : vector<8x1xf32>
    %128 = vector.broadcast %120 : vector<8x1xf32> to vector<8x8xf32>
    %129 = arith.mulf %128, %108 : vector<8x8xf32>
    %130 = arith.truncf %123 : vector<8x8xf32> to vector<8x8xbf16>
    %cst_37 = arith.constant dense<0.000000e+00> : vector<8x8xf32>
    %131 = tpu.matmul %130, %114, %cst_37 {dimension_numbers = #tpu.dot_dimension_numbers<[1], [0], [0], [1], [0, 0, 1, 1], [], []>} : vector<8x8xbf16>, vector<8x8xbf16>, vector<8x8xf32> -> vector<8x8xf32>
    %132 = arith.addf %129, %131 : vector<8x8xf32>
    %c1_i32_38 = arith.constant 1 : i32
    %133 = tpu.reciprocal %127 {approx = true} : vector<8x1xf32> -> vector<8x1xf32>
    %134 = vector.broadcast %133 : vector<8x1xf32> to vector<8x8xf32>
    %135 = arith.mulf %132, %134 : vector<8x8xf32>
    %136 = arith.truncf %135 : vector<8x8xf32> to vector<8x8xbf16>
    %137 = tpu.concatenate %37, %70, %103, %136 in 1 : vector<8x8xbf16>, vector<8x8xbf16>, vector<8x8xbf16>, vector<8x8xbf16> -> vector<8x32xbf16>
    %c0_39 = arith.constant 0 : index
    %c0_40 = arith.constant 0 : index
    %138 = vector.load %arg9[%c0_39, %c0_40] : memref<8x32xbf16, #tpu.memory_space<vmem>>, vector<8x32xbf16>
    tpu.vector_store %arg9[%c0_39, %c0_40], %137 {strides = array<i32>} : memref<8x32xbf16, #tpu.memory_space<vmem>>, vector<8x32xbf16>,
    %c0_41 = arith.constant 0 : index
    %c0_42 = arith.constant 0 : index
    %139 = vector.load %arg9[%c0_41, %c0_42] : memref<8x32xbf16, #tpu.memory_space<vmem>>, vector<8x32xbf16>
    %c0_43 = arith.constant 0 : index
    %c0_44 = arith.constant 0 : index
    %140 = vector.load %arg5[%c0_43, %c0_44] : memref<32x32xbf16, #tpu.memory_space<vmem>>, vector<32x32xbf16>
    %cst_45 = arith.constant dense<0.000000e+00> : vector<8x32xf32>
    %141 = tpu.matmul %139, %140, %cst_45 {dimension_numbers = #tpu.dot_dimension_numbers<[1], [0], [0], [1], [0, 0, 1, 1], [], []>} : vector<8x32xbf16>, vector<32x32xbf16>, vector<8x32xf32> -> vector<8x32xf32>
    %c0_46 = arith.constant 0 : index
    %c0_47 = arith.constant 0 : index
    %142 = vector.load %arg6[%c0_46, %c0_47] : memref<1x32xf32, #tpu.memory_space<vmem>>, vector<1x32xf32>
    %143 = vector.broadcast %142 : vector<1x32xf32> to vector<8x32xf32>
    %144 = arith.addf %141, %143 : vector<8x32xf32>
    %c0_48 = arith.constant 0 : index
    %c0_49 = arith.constant 0 : index
    %c0_50 = arith.constant 0 : index
    %145 = vector.load %arg7[%c0_48, %c0_49, %c0_50] : memref<1x8x32xf32, #tpu.memory_space<vmem>>, vector<1x8x32xf32>
    %146 = vector.shape_cast %145 : vector<1x8x32xf32> to vector<8x32xf32>
    %147 = vector.shape_cast %144 : vector<8x32xf32> to vector<1x8x32xf32>
    tpu.vector_store %arg7[%c0_48, %c0_49, %c0_50], %147 {strides = array<i32>} : memref<1x8x32xf32, #tpu.memory_space<vmem>>, vector<1x8x32xf32>,
    return
  }
  func.func @transform_0(%arg0: i32, %arg1: i32) -> (i32, i32, i32) {
    %c0_i32 = arith.constant 0 : i32
    %c0_i32_0 = arith.constant 0 : i32
    %c0_i32_1 = arith.constant 0 : i32
    return %arg0, %c0_i32, %c0_i32_0 : i32, i32, i32
  }
  func.func @transform_1(%arg0: i32, %arg1: i32) -> (i32, i32) {
    %c0_i32 = arith.constant 0 : i32
    %c0_i32_0 = arith.constant 0 : i32
    %c0_i32_1 = arith.constant 0 : i32
    return %c0_i32, %c0_i32_0 : i32, i32
  }
  func.func @transform_2(%arg0: i32, %arg1: i32) -> (i32, i32) {
    %c0_i32 = arith.constant 0 : i32
    %c0_i32_0 = arith.constant 0 : i32
    %c0_i32_1 = arith.constant 0 : i32
    return %c0_i32, %c0_i32_0 : i32, i32
  }
  func.func @transform_3(%arg0: i32, %arg1: i32) -> (i32, i32) {
    %c0_i32 = arith.constant 0 : i32
    %c0_i32_0 = arith.constant 0 : i32
    %c0_i32_1 = arith.constant 0 : i32
    return %c0_i32, %c0_i32_0 : i32, i32
  }
  func.func @transform_4(%arg0: i32, %arg1: i32) -> (i32, i32) {
    %c0_i32 = arith.constant 0 : i32
    %c0_i32_0 = arith.constant 0 : i32
    %c0_i32_1 = arith.constant 0 : i32
    return %c0_i32, %c0_i32_0 : i32, i32
  }
  func.func @transform_5(%arg0: i32, %arg1: i32) -> (i32, i32, i32) {
    %c0_i32 = arith.constant 0 : i32
    %c0_i32_0 = arith.constant 0 : i32
    return %arg0, %arg1, %c0_i32 : i32, i32, i32
  }
}

</mosaic_0001>

<bundles_post_ra>
// kernel: tpu_custom_call.1
= control target key start
LH: loop header
LB: loop body
LE: loop exit
PB: predicated region body
PF: predicated region fallthrough
CT: control target
= control target key end

     0   :  { %10 = vsyncpa [#allocation5], 0  ;;  %s1854_s0 = inlined_call_operand.hbm [shape: bf16[2,8,32], index: 0, kind: input, shape index: {}]   ;;  %s1855_s1 = inlined_call_operand.hbm [shape: bf16[32,96], index: 1, kind: input, shape index: {}]   ;;  %s1856_s2 = inlined_call_operand.vmem [shape: f32[1,96], index: 2, kind: input, shape index: {}]   ;;  %s1857_s3 = inlined_call_operand.hbm [shape: bf16[32,32], index: 3, kind: input, shape index: {}]   ;;  %s1858_s4 = inlined_call_operand.vmem [shape: f32[1,32], index: 4, kind: input, shape index: {}]   ;;  %s1859_s5 = inlined_call_operand.hbm [shape: f32[2,8,32], index: 5, kind: output, shape index: {}]  }
   0x1   :  { %12 = vsyncpa [#allocation5 + $0x1], 0 }
   0x2   :  { %13 = vsyncpa [#allocation8], 0 }
   0x3   :  { %14 = vsyncpa [#allocation6], 0 }
   0x4   :  { %16 = vsyncpa [#allocation6 + $0x1], 0  ;;  %s1523_s18 = smov 0   ;;  %s1525_s19 = smov 0  }
   0x5   :  { %s1527_s20 = smov 0   ;;  %s1529_s21 = smov 0  }
   0x6   :  { %s1531_s22 = smov 0   ;;  %s1533_s23 = smov 0  }
   0x7 LB: > { %s1045_s24 = sadd.s32 4294967295, %s1469_s23   ;;  %s1046_s25 = sadd.s32 4294967294, %s1469_s23   ;;  %s1469_s23 = sphi %s1533_s23, %s22_s23   ;;  %s1465_s22 = sphi %s1531_s22, %s1881_s22   ;;  %s1461_s21 = sphi %s1529_s21, %s1880_s21   ;;  %s1457_s20 = sphi %s1527_s20, %s1879_s20   ;;  %s1453_s19 = sphi %s1525_s19, %s1878_s19   ;;  %s1449_s18 = sphi %s1523_s18, %s1877_s18  }
   0x8   : > { %p54_p0 = scmp.ne.s32.totalorder %s1453_s19, %s1449_s18  ;;  %p1557_p1 = scmp.eq.s32.totalorder %s1045_s24, 0 }
   0x9   : > { %p1561_p2 = scmp.eq.s32.totalorder %s1045_s24, 1  ;;  %p170_p3 = scmp.eq.s32.totalorder %s1046_s25, 1 }
   0xa   : > { %s1864_s26 = scalar_select %p1557_p1, 1, 0 }
   0xb   : > { %p1567_p4 = por %p1557_p1, %p54_p0  ;;  %p1047_p5 = scmp.ge.s32.totalorder %s1469_s23, 1 }
   0xc   : > { %p1572_p6 = por %p170_p3, %p54_p0  ;;  %p177_p7 = scmp.lt.s32.totalorder %s1469_s23, 3 }
   0xd   : > { %s1866_s28 = scalar_select %p1567_p4, 1, 0 }
   0xe   : > { %s1867_s29 = scalar_select %p1572_p6, 1, 0 }
   0xf   : > { %p1577_p8 = pnand %p1047_p5, %p177_p7  ;;  %s1471_s6 = smov [#allocation7]  }
  0x10   : > { %s189_s7 = sshll.u32 %s1471_s6, 4  ;;  %s1472_s9 = smov [#allocation9]   ;;  %s1581_s7 = int_to_ptr.vmem [resolvable:$true] %s189_s7 }
  0x11   : > { %p1178_p9 = pneg %p1577_p8  ;;  %s205_s10 = sshll.u32 %s1472_s9, 4  ;;  %s1592_s10 = int_to_ptr.vmem [resolvable:$true] %s205_s10 }
  0x12   : > { %s1297_s13 = scalar_lea.hbm %s1855_s1, 256 }
  0x13   : > { %p1588_p11 = pnand %p1178_p9, %p1557_p1  ;;  %p1298_p12 = scmp.ne.s32.totalorder %s1855_s1, %s1297_s13 }
  0x14   : > { %p1304_p5 = scmp.lt.u32.totalorder %s1297_s13, %s1855_s1 }
  0x15   : > { %p1299_p13 = pneg %p1588_p11 }
  0x17   : > { %p1300_p0 = pnand %p1299_p13, %p1298_p12 }
  0x19   : > { %p1301_p3 = pneg %p1300_p0 }
  0x1b   : > { %p1306_p7 = pnand %p1304_p5, %p1301_p3 }
  0x1d   : > { %1309 = shalt.err (!%p1306_p7)
}
  0x1e   : > { %s1310_s24 = scalar_lea.vmem %s1581_s7, 256  ;;  %p1318_p1 = scmp.lt.s32.totalorder %s1581_s7, %s1581_s7 }
  0x1f   : > { %p1311_p9 = scmp.ne.s32.totalorder %s1581_s7, %s1310_s24  ;;  %p1319_p12 = scmp.lt.s32.totalorder %s1310_s24, %s1310_s24 }
  0x21   : > { %p1313_p10 = pnand %p1311_p9, %p1299_p13  ;;  %p1320_p0 = por %p1319_p12, %p1318_p1 }
  0x23   : > { %p1314_p6 = pneg %p1313_p10 }
  0x25   : > { %p1321_p4 = pnand %p1320_p0, %p1314_p6 }
  0x27   : > { %1324 = shalt.err (!%p1321_p4)
}
  0x28   : > { %s1473_s25 = smov 64   ;;  %s1474_s6 = smov 4  }
  0x29   : > { %1181 = dma.hbm_to_vmem [thread:$0]  (!%p1588_p11), %s1855_s1, 256, %s1581_s7, [#allocation8], %s1473_s25, %s1473_s25, %s1474_s6  }
  0x2a   : > { %s1325_s14 = scalar_lea.hbm %s1857_s3, 256 }
  0x2b   : > { %p1326_p1 = scmp.ne.s32.totalorder %s1857_s3, %s1325_s14  ;;  %p1332_p10 = scmp.lt.u32.totalorder %s1325_s14, %s1857_s3 }
  0x2d   : > { %p1328_p4 = pnand %p1326_p1, %p1299_p13 }
  0x2f   : > { %p1329_p6 = pneg %p1328_p4 }
  0x31   : > { %p1334_p3 = pnand %p1332_p10, %p1329_p6 }
  0x33   : > { %1337 = shalt.err (!%p1334_p3)
}
  0x34   : > { %s1338_s7 = scalar_lea.vmem %s1592_s10, 256  ;;  %p1346_p12 = scmp.lt.s32.totalorder %s1592_s10, %s1592_s10 }
  0x35   : > { %p1339_p5 = scmp.ne.s32.totalorder %s1592_s10, %s1338_s7  ;;  %p1347_p0 = scmp.lt.s32.totalorder %s1338_s7, %s1338_s7 }
  0x37   : > { %p1341_p7 = pnand %p1339_p5, %p1299_p13  ;;  %p1348_p1 = por %p1347_p0, %p1346_p12 }
  0x39   : > { %p1342_p9 = pneg %p1341_p7 }
  0x3b   : > { %p1349_p4 = pnand %p1348_p1, %p1342_p9 }
  0x3d   : > { %1352 = shalt.err (!%p1349_p4)
}
  0x3e   : > { %1184 = dma.hbm_to_vmem [thread:$0]  (!%p1588_p11), %s1857_s3, 256, %s1592_s10, [#allocation8], %s1473_s25, %s1473_s25, %s1474_s6  }
  0x3f   : > { %s34_s12 = sadd.s32 1, %s1465_s22  ;;  %s41_s13 = sadd.s32 1, %s1457_s20 }
  0x40   : > { %p36_p13 = scmp.ge.s32.totalorder %s34_s12, 2  ;;  %p48_p6 = scmp.ne.s32.totalorder %s1457_s20, %s1453_s19 }
  0x41   : > { %p49_p10 = scmp.eq.s32.totalorder %s1469_s23, 0  ;;  %p1195_p3 = scmp.lt.s32.totalorder %s1469_s23, 2 }
  0x42   : > { %s1883_s12 = smov (%p36_p13, %s34_s12), 0  ;;  %p1656_p7 = por %p1561_p2, %p48_p6 }
  0x43   : > { %p50_p5 = por %p49_p10, %p48_p6  ;;  %s38_s14 = ssub.s32 %s1465_s22, %s1883_s12 }
  0x44   : > { %s1870_s8 = scalar_select %p1656_p7, 1, 0 }
  0x45   : > { %s222_s15 = sand.u32 1, %s1457_s20   ;;  %p39_p9 = scmp.eq.s32.totalorder %s38_s14, 0 }
  0x46   : > { %s1051_s10 = sshll.u32 %s222_s15, 2  ;;  %s1052_s25 = sshll.u32 %s1465_s22, 6 }
  0x47   : > { %s1665_s6 = scalar_select %p39_p9, %s1457_s20, %s41_s13  }
  0x48   : > { %s1670_s24 = scalar_lea.hbm %s1854_s0, %s1052_s25  ;;  %s226_s27 = scalar_lea.vmem [#allocation4], %s1051_s10 }
  0x49   : > { %s233_s7 = sshll.u32 %s226_s27, 4  ;;  %p1674_p2 = pnand %p1195_p3, %p50_p5  ;;  %s1678_s7 = int_to_ptr.vmem [resolvable:$true] %s233_s7 }
  0x4a   : > { %s223_s11 = scalar_lea.sflag [#allocation5], %s222_s15  ;;  %s1353_s13 = scalar_lea.hbm %s1670_s24, 64 }
  0x4b   : > { %p1354_p11 = scmp.ne.s32.totalorder %s1670_s24, %s1353_s13  ;;  %p1355_p12 = pneg %p1674_p2 }
  0x4c   : > { %s1358_s25 = scalar_lea.hbm %s1854_s0, 128  ;;  %p1359_p4 = scmp.lt.u32.totalorder %s1670_s24, %s1854_s0 }
  0x4d   : > { %p1356_p0 = pnand %p1355_p12, %p1354_p11  ;;  %p1360_p13 = scmp.lt.u32.totalorder %s1358_s25, %s1353_s13 }
  0x4e   : > { %p1362_p10 = scmp.lt.u32.totalorder %s1353_s13, %s1670_s24 }
  0x4f   : > { %p1357_p1 = pneg %p1356_p0  ;;  %p1361_p6 = por %p1360_p13, %p1359_p4 }
  0x51   : > { %p1363_p3 = por %p1362_p10, %p1361_p6 }
  0x53   : > { %p1364_p5 = pnand %p1363_p3, %p1357_p1 }
  0x55   : > { %1367 = shalt.err (!%p1364_p5)
}
  0x56   : > { %s1368_s15 = scalar_lea.vmem %s1678_s7, 64  ;;  %s1475_s27 = smov [#allocation4]  }
  0x57   : > { %p1369_p9 = scmp.ne.s32.totalorder %s1678_s7, %s1368_s15  ;;  %s1373_s14 = sshll.u32 %s1475_s27, 4  ;;  %s1374_s14 = int_to_ptr.vmem [resolvable:$false] %s1373_s14 }
  0x58   : > { %s1375_s10 = scalar_lea.vmem %s1374_s14, 128  ;;  %p1376_p7 = scmp.lt.s32.totalorder %s1678_s7, %s1374_s14 }
  0x59   : > { %p1371_p11 = pnand %p1369_p9, %p1355_p12  ;;  %p1377_p4 = scmp.lt.s32.totalorder %s1375_s10, %s1368_s15 }
  0x5b   : > { %p1372_p0 = pneg %p1371_p11  ;;  %p1378_p13 = por %p1377_p4, %p1376_p7 }
  0x5d   : > { %p1379_p6 = pnand %p1378_p13, %p1372_p0 }
  0x5f   : > { %1382 = shalt.err (!%p1379_p6)
}
  0x60   : > { %1188 = dma.hbm_to_vmem [thread:$0]  (!%p1674_p2), %s1670_s24, 64, %s1678_s7, %s223_s11  }
  0x61   : > { %242 = sbr.rel (%p1577_p8) target bundleno = 1460 (0x5b4), region = 40  ;;  %s1708_s13 = sand.u32 (!%p1577_p8), 1, %s1453_s19  }
  0x62   : > { %s1054_s25 = sshll.u32 (!%p1577_p8), %s1708_s13, 2  ;;  %s245_s16 = scalar_lea.sflag (!%p1577_p8), [#allocation5], %s1708_s13 }
  0x63   : > { %s248_s17 = scalar_lea.vmem (!%p1577_p8), [#allocation4], %s1054_s25  ;;  %p1872_p7 = scmp.ne.s32.totalorder (!%p1577_p8), %s1866_s28, 0 }
  0x68   : > { %1436 = dma.done.wait (%p1872_p7), %s245_s16, 64  }
  0x69   : > { %1438 = vsyncadd (%p1872_p7), %s245_s16, 4294967232  ;;  %p1873_p12 = scmp.ne.s32.totalorder %s1864_s26, 0 }
  0x6b   : > { %1440 = dma.done.wait (%p1873_p12), [#allocation8], 512  }
  0x6c   : > { %1442 = vsyncadd (%p1873_p12), [#allocation8], 4294966784  ;;  %v1476_v0 = vmov 0.0   ;;  %vm1477_vm0 = vmmov 0   ;;  %v1267_v1 = vld [vmem:[#allocation7] sm:$0xff]   ;;  %v1268_v2 = vld [vmem:[#allocation7 + $0x8] sm:$0xff]  }
  0x6d   : > { %1102 = vmatprep.subr.bf16.mxu0 %v1476_v0  ;;  %1106 = vmatprep.mubr.msk.bf16.mxu0 %vm1477_vm0, %v1476_v0  ;;  %v295_v3 = vld [vmem:[%s248_s17] sm:$0xf]  ;;  %vm312_vm1 = vcmask 261120   ;;  %v1058_v4 = vld [vmem:[%s1856_s2] ss:$0 sm:$0xff]  ;;  %vm357_vm2 = vcmask 781312  }
  0x6e   : > { %1110 = vmatprep.subr.bf16.mxu1 %v1476_v0  ;;  %1112 = vmatprep.mubr.msk.bf16.mxu1 %vm1477_vm0, %v1476_v0  ;;  %s1478_s30 = smov 96   ;;  %s1479_s24 = smov 120   ;;  %vm371_vm3 = vcmask 64512   ;;  %vm438_vm4 = vcmask 1043456   ;;  %vm852_vm5 = vcmask 130048   ;;  %vm855_vm6 = vcmask 195584  }
  0x6f   : > { %1103 = vmatpush3.bf16.msra.mxu0 %v1267_v1  ;;  %s1480_s7 = smov 88   ;;  %s1481_s9 = smov 80   ;;  %vm859_vm7 = vcmask 257024  }
  0x70   : > { %1104 = vmatprep.subr.bf16.mxu0 %v1476_v0  ;;  %s1482_s11 = smov 112   ;;  %s1483_s15 = smov 72  }
  0x71   : > { %s1484_s27 = smov 104   ;;  %s1485_s14 = smov 56  }
  0x72   : > { %s1486_s10 = smov 64   ;;  %s1487_s25 = smov 40  }
  0x73   : > { %1105 = vmatpush3.bf16.msra.mxu0 %v1268_v2  ;;  %s1488_s16 = smov 48   ;;  %s1489_s17 = smov 8  }
  0x74   : > { %1116 = vmatprep.subr.bf16.mxu0 %v1476_v0  ;;  %s1490_s26 = smov 16   ;;  %s1491_s28 = smov 24  }
  0x75   : > { %p1874_p2 = scmp.ne.s32.totalorder %s1870_s8, 0 }
  0x76   : > { %1107 = vmatmul.mubr.msk.bf16.vlgmr.msra.gmra.mrb[0].mxu0 %vm312_vm1, %v295_v3 }
  0x77   : > { %1118 = vmatprep.mubr.msk.bf16.mxu0 %vm1477_vm0, %v1476_v0 }
 0x149   : > { %v350_v5 = vpop.f32.mrb[0].mxu0 }
 0x14a   : > { %v351_v6 = vadd.f32 %v1058_v4, %v350_v5  ;;  %v1108_v7 = vpop.f32.mrb[1].mxu0 }
 0x14b   : > { %v353_v8 = vpop.f32.mrb[2].mxu0 }
 0x14c   : > { %v356_v9 = vpack.c.bf16 %v351_v6, %v351_v6  ;;  %v1109_v10 = vpop.f32.mrb[3].mxu0 }
 0x14e   : > { %358 = vst.msk [vmem:[#allocation2] sm:$0xf] %vm357_vm2, %v356_v9 }
 0x155   : > { %v1734_v11 = vld [vmem:[#allocation2] ss:$0 sps:$4 sm:$0xff]  }
 0x156   : > { %v364_v12 = vld [vmem:[#allocation2] sm:$0xf]  ;;  %369 = vrot.lane.b32.xlu0 %v1734_v11, %s1478_s30  ;;  %s1057_s30 = sshll.u32 %s1708_s13, 3 }
 0x157   : > { %v1065_v13 = vcombine.low %v364_v12, %v364_v12 }
 0x159   : > { %489 = vrot.lane.b32.xlu1 %v1065_v13, %s1479_s24 }
 0x15a   : > { %491 = vrot.lane.b32.xlu0 %v1734_v11, %s1480_s7 }
 0x15d   : > { %608 = vrot.lane.b32.xlu1 %v1734_v11, %s1481_s9  ;;  %s1077_s9 = sshll.u32 %s1461_s21, 7  ;;  %s931_s21 = scalar_lea.sflag [#allocation6], %s1708_s13 }
 0x15e   : > { %606 = vrot.lane.b32.xlu0 %v1065_v13, %s1482_s11  ;;  %s282_s11 = scalar_lea.vmem [#allocation10], %s1057_s30 }
 0x161   : > { %725 = vrot.lane.b32.xlu1 %v1734_v11, %s1483_s15  ;;  %s945_s15 = sshll.u32 %s282_s11, 4  ;;  %s1806_s15 = int_to_ptr.vmem [resolvable:$true] %s945_s15 }
 0x162   : > { %723 = vrot.lane.b32.xlu0 %v1065_v13, %s1484_s27 }
 0x1c8   : > { %v370_v14 = vpop.permute.xlu0 %369 }
 0x1c9   : > { %v376_v15 = vsel %vm371_vm3, %v370_v14, 0 }
 0x1ca   : > { %1111 = vmatpush3.bf16.xpose.msra.mxu1 %v376_v15 }
 0x1cb   : > { %1122 = vmatprep.subr.bf16.mxu1 %v1476_v0  ;;  %v490_v17 = vpop.permute.xlu1 %489 }
 0x1cc   : > { %v492_v16 = vpop.permute.xlu0 %491 }
 0x1cd   : > { %v497_v18 = vsel %vm371_vm3, %v492_v16, 0 }
 0x1cf   : > { %v609_v19 = vpop.permute.xlu1 %608 }
 0x1d0   : > { %v614_v20 = vsel %vm371_vm3, %v609_v19, 0  ;;  %v607_v22 = vpop.permute.xlu0 %606 }
 0x1d1   : > { %1113 = vmatmul.mubr.msk.bf16.vlgmr.msra.gmra.mrb[0].mxu1 %vm371_vm3, %v364_v12 }
 0x1d2   : > { %1123 = vmatpush3.bf16.xpose.msra.mxu1 %v497_v18  ;;  %1124 = vmatprep.mubr.msk.bf16.mxu1 %vm1477_vm0, %v1476_v0 }
 0x1d3   : > { %1134 = vmatprep.subr.bf16.mxu1 %v1476_v0  ;;  %v726_v21 = vpop.permute.xlu1 %725 }
 0x1d4   : > { %v731_v23 = vsel %vm371_vm3, %v726_v21, 0  ;;  %v724_v24 = vpop.permute.xlu0 %723 }
 0x1d9   : > { %1125 = vmatmul.mubr.msk.bf16.vlgmr.msra.gmra.mrb[4].mxu1 %vm371_vm3, %v490_v17 }
 0x1da   : > { %1135 = vmatpush3.bf16.xpose.msra.mxu1 %v614_v20  ;;  %1136 = vmatprep.mubr.msk.bf16.mxu1 %vm1477_vm0, %v1476_v0 }
 0x1db   : > { %1146 = vmatprep.subr.bf16.mxu1 %v1476_v0 }
 0x1e1   : > { %1137 = vmatmul.mubr.msk.bf16.vlgmr.msra.gmra.mrb[8].mxu1 %vm371_vm3, %v607_v22 }
 0x1e2   : > { %1147 = vmatpush3.bf16.xpose.msra.mxu1 %v731_v23  ;;  %1148 = vmatprep.mubr.msk.bf16.mxu1 %vm1477_vm0, %v1476_v0 }
 0x1e3   : > { %1158 = vmatprep.subr.bf16.mxu1 %v1476_v0 }
 0x1e9   : > { %1149 = vmatmul.mubr.msk.bf16.vlgmr.msra.gmra.mrb[12].mxu1 %vm371_vm3, %v724_v24 }
 0x1ea   : > { %1162 = vmatprep.mubr.msk.bf16.mxu1 %vm1477_vm0, %v1476_v0 }
 0x2a4   : > { %v412_v25 = vpop.f32.mrb[0].mxu1 }
 0x2a5   : > { %v1114_v26 = vpop.f32.mrb[1].mxu1  ;;  %v418_v27 = vsel %vm371_vm3, %v412_v25, -inf }
 0x2a6   : > { %419 = vmax.xlane.f32.xlu1 %v418_v27  ;;  %v415_v28 = vpop.f32.mrb[2].mxu1 }
 0x2a7   : > { %v1115_v29 = vpop.f32.mrb[3].mxu1 }
 0x2ac   : > { %v533_v30 = vpop.f32.mrb[4].mxu1 }
 0x2ad   : > { %v1126_v31 = vpop.f32.mrb[5].mxu1  ;;  %v539_v32 = vsel %vm371_vm3, %v533_v30, -inf }
 0x2ae   : > { %540 = vmax.xlane.f32.xlu0 %v539_v32  ;;  %v536_v33 = vpop.f32.mrb[6].mxu1 }
 0x2af   : > { %v1127_v34 = vpop.f32.mrb[7].mxu1 }
 0x2b4   : > { %v650_v35 = vpop.f32.mrb[8].mxu1 }
 0x2b5   : > { %v1138_v36 = vpop.f32.mrb[9].mxu1  ;;  %v656_v37 = vsel %vm371_vm3, %v650_v35, -inf }
 0x2b6   : > { %657 = vmax.xlane.f32.xlu0 %v656_v37  ;;  %v653_v38 = vpop.f32.mrb[10].mxu1 }
 0x2b7   : > { %554 = vrot.lane.b32.xlu1 %v1734_v11, %s1485_s14  ;;  %v1139_v39 = vpop.f32.mrb[11].mxu1 }
 0x2bc   : > { %v767_v40 = vpop.f32.mrb[12].mxu1 }
 0x2bd   : > { %v1150_v41 = vpop.f32.mrb[13].mxu1  ;;  %v773_v44 = vsel %vm371_vm3, %v767_v40, -inf }
 0x2be   : > { %v770_v42 = vpop.f32.mrb[14].mxu1 }
 0x2bf   : > { %v1151_v43 = vpop.f32.mrb[15].mxu1 }
 0x2cc   : > { %433 = vrot.lane.b32.xlu0 %v1734_v11, %s1486_s10  ;;  %s1804_s10 = scalar_lea.hbm %s1859_s5, %s1077_s9 }
 0x2d0   : > { %788 = vrot.lane.b32.xlu0 %v1734_v11, %s1487_s25  ;;  %s1383_s25 = scalar_lea.vmem %s1806_s15, 128 }
 0x2d1   : > { %p1384_p8 = scmp.ne.s32.totalorder %s1806_s15, %s1383_s25 }
 0x2d3   : > { %p1385_p1 = pnand %p1384_p8, %p1874_p2 }
 0x2d5   : > { %p1386_p10 = pneg %p1385_p1 }
 0x2db   : > { %774 = vmax.xlane.f32.xlu1 %v773_v44 }
 0x2ec   : > { %671 = vrot.lane.b32.xlu1 %v1734_v11, %s1488_s16  ;;  %s1492_s16 = smov [#allocation10]  }
 0x333   : > { %v420_v45 = vpop.xlane.xlu1 %419 }
 0x334   : > { %v424_v46 = vsub.f32 %v412_v25, %v420_v45  ;;  %v421_v14 = vsub.f32 -inf, %v420_v45 }
 0x336   : > { %v425_v47 = vmul.f32 1.442695, %v424_v46  ;;  %v422_v15 = vmul.f32 1.442695, %v421_v14 }
 0x337   : > { %v555_v57 = vpop.permute.xlu1 %554 }
 0x338   : > { %1273 = vpow2.f32 %v425_v47  ;;  %v560_v60 = vsel %vm438_vm4, %v555_v57, 0 }
 0x33b   : > { %v541_v48 = vpop.xlane.xlu0 %540 }
 0x33c   : > { %v545_v49 = vsub.f32 %v533_v30, %v541_v48  ;;  %v542_v16 = vsub.f32 -inf, %v541_v48 }
 0x33e   : > { %v546_v50 = vmul.f32 1.442695, %v545_v49  ;;  %v543_v17 = vmul.f32 1.442695, %v542_v16 }
 0x340   : > { %1275 = vpow2.f32 %v546_v50 }
 0x342   : > { %v1274_v54 = vpop.eup %1273 }
 0x343   : > { %v1768_v51 = vpop.xlane.xlu0 %657  ;;  %v432_v58 = vpack.c.bf16 %v1274_v54, %v1274_v54  ;;  %v428_v62 = vsel %vm371_vm3, %v1274_v54, 0.0 }
 0x344   : > { %v662_v52 = vsub.f32 %v650_v35, %v1768_v51  ;;  %v659_v30 = vsub.f32 -inf, %v1768_v51 }
 0x346   : > { %v663_v53 = vmul.f32 1.442695, %v662_v52  ;;  %v660_v34 = vmul.f32 1.442695, %v659_v30 }
 0x347   : > { %v434_v55 = vpop.permute.xlu0 %433 }
 0x348   : > { %v440_v56 = vsel %vm438_vm4, %v434_v55, 0  ;;  %1277 = vpow2.f32 %v663_v53 }
 0x349   : > { %1117 = vmatpush3.bf16.msra.mxu0 %v440_v56 }
 0x34a   : > { %1128 = vmatprep.subr.bf16.mxu0 %v1476_v0  ;;  %v1276_v59 = vpop.eup %1275 }
 0x34b   : > { %v549_v61 = vsel %vm371_vm3, %v1276_v59, 0.0  ;;  %v553_v63 = vpack.c.bf16 %v1276_v59, %v1276_v59  ;;  %v789_v8 = vpop.permute.xlu0 %788 }
 0x34c   : > { %1119 = vmatmul.mubr.msk.bf16.vlgmr.msra.gmra.mrb[4].mxu0 %vm371_vm3, %v432_v58  ;;  %550 = vadd.xlane.f32.xlu1 %v549_v61  ;;  %v794_v10 = vsel %vm438_vm4, %v789_v8, 0 }
 0x34d   : > { %1129 = vmatpush3.bf16.msra.mxu0 %v560_v60  ;;  %1130 = vmatprep.mubr.msk.bf16.mxu0 %vm1477_vm0, %v1476_v0  ;;  %v1271_v60 = vld [vmem:[#allocation9] sm:$0xff]  }
 0x34e   : > { %1140 = vmatprep.subr.bf16.mxu0 %v1476_v0  ;;  %1159 = vmatpush3.bf16.msra.mxu1 %v1271_v60 }
 0x34f   : > { %1160 = vmatprep.subr.bf16.mxu1 %v1476_v0 }
 0x350   : > { %429 = vadd.xlane.f32.xlu1 %v428_v62  ;;  %v1272_v62 = vld [vmem:[#allocation9 + $0x8] sm:$0xff]  }
 0x352   : > { %v1278_v1 = vpop.eup %1277  ;;  %1161 = vmatpush3.bf16.msra.mxu1 %v1272_v62 }
 0x353   : > { %v666_v2 = vsel %vm371_vm3, %v1278_v1, 0.0  ;;  %v670_v9 = vpack.c.bf16 %v1278_v1, %v1278_v1 }
 0x354   : > { %1131 = vmatmul.mubr.msk.bf16.vlgmr.msra.gmra.mrb[8].mxu0 %vm371_vm3, %v553_v63  ;;  %667 = vadd.xlane.f32.xlu0 %v666_v2 }
 0x355   : > { %1142 = vmatprep.mubr.msk.bf16.mxu0 %vm1477_vm0, %v1476_v0 }
 0x368   : > { %v775_v3 = vpop.xlane.xlu1 %774 }
 0x369   : > { %v779_v4 = vsub.f32 %v767_v40, %v775_v3  ;;  %v776_v42 = vsub.f32 -inf, %v775_v3 }
 0x36b   : > { %v780_v5 = vmul.f32 1.442695, %v779_v4  ;;  %v777_v44 = vmul.f32 1.442695, %v776_v42 }
 0x36c   : > { %v672_v6 = vpop.permute.xlu1 %671 }
 0x36d   : > { %v677_v7 = vsel %vm438_vm4, %v672_v6, 0  ;;  %1279 = vpow2.f32 %v780_v5 }
 0x36e   : > { %1141 = vmatpush3.bf16.msra.mxu0 %v677_v7  ;;  %1281 = vpow2.f32 %v422_v15  ;;  %v1072_v15 = vld [vmem:[%s1858_s4] ss:$0 sm:$0xff] }
 0x36f   : > { %1152 = vmatprep.subr.bf16.mxu0 %v1476_v0  ;;  %1283 = vpow2.f32 %v543_v17 }
 0x371   : > { %1143 = vmatmul.mubr.msk.bf16.vlgmr.msra.gmra.mrb[12].mxu0 %vm371_vm3, %v670_v9 }
 0x372   : > { %1153 = vmatpush3.bf16.msra.mxu0 %v794_v10  ;;  %1154 = vmatprep.mubr.msk.bf16.mxu0 %vm1477_vm0, %v1476_v0 }
 0x377   : > { %v1280_v11 = vpop.eup %1279 }
 0x378   : > { %v783_v12 = vsel %vm371_vm3, %v1280_v11, 0.0  ;;  %v787_v13 = vpack.c.bf16 %v1280_v11, %v1280_v11  ;;  %v1282_v19 = vpop.eup %1281 }
 0x379   : > { %784 = vadd.xlane.f32.xlu0 %v783_v12  ;;  %v427_v21 = vmul.f32 0.0, %v1282_v19  ;;  %v1284_v23 = vpop.eup %1283 }
 0x37a   : > { %1155 = vmatmul.mubr.msk.bf16.vlgmr.msra.gmra.mrb[16].mxu0 %vm371_vm3, %v787_v13  ;;  %v548_v24 = vmul.f32 0.0, %v1284_v23 }
 0x3d9   : > { %v551_v18 = vpop.xlane.xlu1 %550 }
 0x3da   : > { %v552_v25 = vadd.f32 %v551_v18, %v548_v24 }
 0x3dd   : > { %v430_v20 = vpop.xlane.xlu1 %429 }
 0x3de   : > { %v431_v22 = vadd.f32 %v430_v20, %v427_v21 }
 0x3e0   : > { %1285 = vrcp.f32 %v431_v22 }
 0x3e1   : > { %1287 = vrcp.f32 %v552_v25  ;;  %v668_v46 = vpop.xlane.xlu0 %667 }
 0x3e2   : > { %1289 = vpow2.f32 %v660_v34 }
 0x3e3   : > { %1291 = vpow2.f32 %v777_v44 }
 0x3ea   : > { %v1286_v29 = vpop.eup %1285 }
 0x3eb   : > { %v1288_v38 = vpop.eup %1287 }
 0x3ec   : > { %v1290_v45 = vpop.eup %1289 }
 0x3ed   : > { %v665_v47 = vmul.f32 0.0, %v1290_v45  ;;  %v1292_v49 = vpop.eup %1291 }
 0x3ee   : > { %v782_v51 = vmul.f32 0.0, %v1292_v49 }
 0x3ef   : > { %v669_v48 = vadd.f32 %v668_v46, %v665_v47 }
 0x3f1   : > { %1293 = vrcp.f32 %v669_v48 }
 0x3fb   : > { %v1294_v56 = vpop.eup %1293 }
 0x406   : > { %v785_v50 = vpop.xlane.xlu0 %784 }
 0x407   : > { %v786_v52 = vadd.f32 %v785_v50, %v782_v51 }
 0x409   : > { %1295 = vrcp.f32 %v786_v52 }
 0x413   : > { %v1296_v3 = vpop.eup %1295 }
 0x41f   : > { %v476_v26 = vpop.f32.mrb[4].mxu0 }
 0x420   : > { %v482_v27 = vadd.f32 %v476_v26, %v427_v21  ;;  %v1120_v28 = vpop.f32.mrb[5].mxu0 }
 0x421   : > { %v479_v31 = vpop.f32.mrb[6].mxu0 }
 0x422   : > { %v484_v32 = vmul.f32 %v1286_v29, %v482_v27  ;;  %v1121_v33 = vpop.f32.mrb[7].mxu0 }
 0x424   : > { %v485_v10 = vpack.c.bf16 %v484_v32, %v484_v32 }
 0x427   : > { %v596_v35 = vpop.f32.mrb[8].mxu0 }
 0x428   : > { %v602_v36 = vadd.f32 %v596_v35, %v548_v24  ;;  %v1132_v37 = vpop.f32.mrb[9].mxu0 }
 0x429   : > { %v599_v39 = vpop.f32.mrb[10].mxu0 }
 0x42a   : > { %v604_v40 = vmul.f32 %v1288_v38, %v602_v36  ;;  %v1133_v41 = vpop.f32.mrb[11].mxu0 }
 0x42c   : > { %v605_v43 = vpack.c.bf16 %v604_v40, %v604_v40 }
 0x42e   : > { %841 = vrot.lane.b32.xlu0 %v605_v43, %s1489_s17  ;;  %s1387_s17 = sshll.u32 %s1492_s16, 4  ;;  %s1388_s17 = int_to_ptr.vmem [resolvable:$false] %s1387_s17 }
 0x42f   : > { %p1390_p3 = scmp.lt.s32.totalorder %s1806_s15, %s1388_s17 }
 0x444   : > { %v713_v53 = vpop.f32.mrb[12].mxu0 }
 0x445   : > { %v719_v54 = vadd.f32 %v713_v53, %v665_v47  ;;  %v1144_v55 = vpop.f32.mrb[13].mxu0 }
 0x446   : > { %v716_v57 = vpop.f32.mrb[14].mxu0 }
 0x447   : > { %v721_v58 = vmul.f32 %v1294_v56, %v719_v54  ;;  %v1145_v59 = vpop.f32.mrb[15].mxu0 }
 0x449   : > { %v722_v61 = vpack.c.bf16 %v721_v58, %v721_v58 }
 0x44b   : > { %844 = vrot.lane.b32.xlu1 %v722_v61, %s1490_s26  ;;  %s1389_s26 = scalar_lea.vmem %s1388_s17, 256 }
 0x44c   : > { %p1391_p5 = scmp.lt.s32.totalorder %s1389_s26, %s1383_s25 }
 0x44d   : > { %v830_v63 = vpop.f32.mrb[16].mxu0 }
 0x44e   : > { %v836_v1 = vadd.f32 %v830_v63, %v782_v51  ;;  %v1156_v2 = vpop.f32.mrb[17].mxu0  ;;  %p1392_p9 = por %p1391_p5, %p1390_p3 }
 0x44f   : > { %v833_v4 = vpop.f32.mrb[18].mxu0 }
 0x450   : > { %v838_v5 = vmul.f32 %v1296_v3, %v836_v1  ;;  %v1157_v6 = vpop.f32.mrb[19].mxu0  ;;  %p1393_p11 = pnand %p1392_p9, %p1386_p10 }
 0x452   : > { %v839_v7 = vpack.c.bf16 %v838_v5, %v838_v5 }
 0x454   : > { %847 = vrot.lane.b32.xlu1 %v839_v7, %s1491_s28 }
 0x4a0   : > { %v842_v8 = vpop.permute.xlu0 %841 }
 0x4a1   : > { %v851_v0 = vsel %vm371_vm3, %v485_v10, %v842_v8 }
 0x4bd   : > { %v845_v9 = vpop.permute.xlu1 %844 }
 0x4be   : > { %v854_v11 = vsel %vm852_vm5, %v851_v0, %v845_v9 }
 0x4c6   : > { %v848_v12 = vpop.permute.xlu1 %847 }
 0x4c7   : > { %v857_v13 = vsel %vm855_vm6, %v854_v11, %v848_v12 }
 0x4c8   : > { %860 = vst.msk [vmem:[#allocation3] sm:$0xf] %vm859_vm7, %v857_v13 }
 0x4cf   : > { %v861_v14 = vld [vmem:[#allocation3] sm:$0xf] }
 0x4d0   : > { %1163 = vmatmul.mubr.msk.bf16.vlgmr.msra.gmra.mrb[16].mxu1 %vm312_vm1, %v861_v14 }
 0x5a3   : > { %v923_v16 = vpop.f32.mrb[16].mxu1 }
 0x5a4   : > { %v924_v17 = vadd.f32 %v1072_v15, %v923_v16  ;;  %v1164_v18 = vpop.f32.mrb[17].mxu1 }
 0x5a5   : > { %v926_v19 = vpop.f32.mrb[18].mxu1 }
 0x5a6   : > { %v1165_v20 = vpop.f32.mrb[19].mxu1  ;;  %929 = vst.msk [vmem:[%s282_s11] sm:$0xff] %vm312_vm1, %v924_v17 }
 0x5a7   : > { %1396 = shalt.err (!%p1393_p11)
}
 0x5a8   : > { %s1397_s13 = scalar_lea.hbm %s1804_s10, 128  ;;  %s1401_s24 = scalar_lea.hbm %s1859_s5, 256 }
 0x5a9   : > { %p1398_p0 = scmp.ne.s32.totalorder %s1804_s10, %s1397_s13  ;;  %p1402_p6 = scmp.lt.u32.totalorder %s1804_s10, %s1859_s5 }
 0x5aa   : > { %p1403_p7 = scmp.lt.u32.totalorder %s1401_s24, %s1397_s13  ;;  %p1405_p8 = scmp.lt.u32.totalorder %s1397_s13, %s1804_s10 }
 0x5ab   : > { %p1399_p4 = pnand %p1398_p0, %p1874_p2 }
 0x5ac   : > { %p1404_p12 = por %p1403_p7, %p1402_p6 }
 0x5ad   : > { %p1400_p13 = pneg %p1399_p4 }
 0x5ae   : > { %p1406_p1 = por %p1405_p8, %p1404_p12 }
 0x5b0   : > { %p1407_p10 = pnand %p1406_p1, %p1400_p13 }
 0x5b2   : > { %1410 = shalt.err (!%p1407_p10)
}
 0x5b3   : > { %1176 = dma.vmem_to_hbm [thread:$0]  (%p1874_p2), %s1806_s15, 128, %s1804_s10, %s931_s21  }
 0x5b4 PF: > { %s957_s11 = sand.u32 1, %s1449_s18   ;;  %p1875_p3 = scmp.ne.s32.totalorder %s1867_s29, 0 }
 0x5b5   : > { %p1876_p5 = scmp.ge.s32.totalorder %s1469_s23, 2  ;;  %s958_s27 = scalar_lea.sflag [#allocation6], %s957_s11 }
 0x5b7   : > { %p1190_p9 = pnand %p1876_p5, %p1875_p3 }
 0x5b9   : > { %1444 = dma.done.wait (!%p1190_p9), %s958_s27, 128  }
 0x5ba   : > { %1446 = vsyncadd (!%p1190_p9), %s958_s27, 4294967168  ;;  %s22_s23 = sadd.s32 1, %s1469_s23   ;;  %s1877_s18 = smov %s1453_s19 }
 0x5bb   : > { %p19_p11 = scmp.ge.s32.totalorder %s22_s23, 4   ;;  %s1878_s19 = smov %s1457_s20 }
 0x5bc   : > { %s1879_s20 = smov %s1665_s6  ;;  %s1880_s21 = smov %s1465_s22 }
 0x5bd   : > { %s1881_s22 = smov %s1883_s12  ;;  %21 = sbr.rel (!%p19_p11) target bundleno = 7 (0x7), region = 98 }
 0x5c4   :  { %963 = vsyncpa [#allocation5], 1 }
 0x5c5   :  { %965 = vsyncpa [#allocation5 + $0x1], 1 }
 0x5c6   :  { %966 = vsyncpa [#allocation8], 1 }
 0x5c7   :  { %967 = vsyncpa [#allocation6], 1 }
 0x5c8   :  { %969 = vsyncpa [#allocation6 + $0x1], 1 }

</bundles_post_ra>
